<compile_context>
chip_gen: v7x
topology: tpu7x:2x2x1
jax: 0.10.0
libtpu: 0.0.40
codegen_flags: <defaults>
</compile_context>

<pallas_src>
import functools

import jax
import jax.numpy as jnp
from jax.experimental import pallas as pl
from jax.experimental.pallas import tpu as pltpu


def _cosine_sim_kernel(x_ref, y_ref, o_ref, *, inv_temp, eps):
    # Load native-dtype tiles, upcast to f32 for the arithmetic.
    x = x_ref[...].astype(jnp.float32)
    y = y_ref[...].astype(jnp.float32)

    # Per-row dot product and L2 norms (cross-lane reduce -> XLU, sqrt -> EUP).
    dot = jnp.sum(x * y, axis=1, keepdims=True)          # (TB, 1)
    nx = jnp.sqrt(jnp.sum(x * x, axis=1, keepdims=True))  # (TB, 1)
    ny = jnp.sqrt(jnp.sum(y * y, axis=1, keepdims=True))  # (TB, 1)

    # torch.nn.CosineSimilarity:  x.y / max(||x|| * ||y||, eps)   then / temp.
    denom = jnp.maximum(nx * ny, eps)
    o_ref[...] = (dot / denom) * inv_temp


def similarity(x, y, temp, *, eps=1e-8):
    """Pallas implementation of Similarity.forward: cos_sim(x, y, dim=-1)/temp.

    Supports arbitrary broadcasting of x against y (e.g. the SimCSE pattern
    x[:, None, :] vs y[None, :, :]); broadcasting is resolved in the wrapper
    and the kernel works on a flat (N, D) row layout.
    Returns float32 with the broadcasted leading shape.
    """
    x = jnp.asarray(x)
    y = jnp.asarray(y)
    xb, yb = jnp.broadcast_arrays(x, y)
    out_shape = xb.shape[:-1]
    D = xb.shape[-1]

    x2 = xb.reshape(-1, D)
    y2 = yb.reshape(-1, D)
    N = x2.shape[0]
    itemsize = jnp.dtype(x2.dtype).itemsize

    # Row-tile size: keep (2 inputs x 2 pipeline buffers x TB*D*itemsize) a few
    # MiB so the same tiling fits v5e's 16 MiB default scoped VMEM and v7x's
    # smaller 64 MiB physical VMEM, while staying big enough to hide DMA.
    budget_bytes = 8 * 1024 * 1024
    tb = budget_bytes // max(1, 4 * D * itemsize)
    tb = min(tb, 1024)                       # diminishing returns past ~1k rows
    tb = max(8, (tb // 8) * 8)               # sublane-aligned
    tb = min(tb, max(8, -(-N // 8) * 8))     # don't over-pad tiny inputs

    n_pad = -(-N // tb) * tb
    if n_pad != N:
        pad = n_pad - N
        # Zero rows -> dot = 0, norms = 0 -> sim = 0 / eps = 0; sliced off below.
        x2 = jnp.pad(x2, ((0, pad), (0, 0)))
        y2 = jnp.pad(y2, ((0, pad), (0, 0)))

    grid = (n_pad // tb,)
    kernel = functools.partial(
        _cosine_sim_kernel, inv_temp=float(1.0 / temp), eps=float(eps)
    )

    cost = pl.CostEstimate(
        flops=int(6 * N * D),
        transcendentals=int(2 * N),
        bytes_accessed=int(2 * N * D * itemsize + N * 4),
    )

    out = pl.pallas_call(
        kernel,
        out_shape=jax.ShapeDtypeStruct((n_pad, 1), jnp.float32),
        grid=grid,
        in_specs=[
            pl.BlockSpec((tb, D), lambda i: (i, 0)),
            pl.BlockSpec((tb, D), lambda i: (i, 0)),
        ],
        out_specs=pl.BlockSpec((tb, 1), lambda i: (i, 0)),
        compiler_params=pltpu.CompilerParams(
            dimension_semantics=("parallel",),
        ),
        cost_estimate=cost,
    )(x2, y2)

    return out[:N, 0].reshape(out_shape)


def _reference(x, y, temp, eps=1e-8):
    x32 = jnp.asarray(x, jnp.float32)
    y32 = jnp.asarray(y, jnp.float32)
    x32, y32 = jnp.broadcast_arrays(x32, y32)
    dot = jnp.sum(x32 * y32, axis=-1)
    nx = jnp.sqrt(jnp.sum(x32 * x32, axis=-1))
    ny = jnp.sqrt(jnp.sum(y32 * y32, axis=-1))
    return dot / jnp.maximum(nx * ny, eps) / temp


if __name__ == "__main__":
    key = jax.random.PRNGKey(0)
    k1, k2 = jax.random.split(key, 2)

    B, D = 8, 32           # small batch of hidden-dim-32 embeddings
    temp = 0.05            # SimCSE-style temperature

    x = jax.random.normal(k1, (B, D), dtype=jnp.float32)
    y = jax.random.normal(k2, (B, D), dtype=jnp.float32)

    # 1) Elementwise (same-shape) cosine similarity.
    out = similarity(x, y, temp)
    jax.block_until_ready(out)
    ref = _reference(x, y, temp)
    assert out.shape == (B,), out.shape
    assert jnp.allclose(out, ref, atol=1e-5, rtol=1e-5), (out, ref)

    # 2) SimCSE broadcasting pattern: (B, 1, D) vs (1, B, D) -> (B, B) logits.
    out_bb = similarity(x[:, None, :], y[None, :, :], temp)
    jax.block_until_ready(out_bb)
    ref_bb = _reference(x[:, None, :], y[None, :, :], temp)
    assert out_bb.shape == (B, B), out_bb.shape
    assert jnp.allclose(out_bb, ref_bb, atol=1e-5, rtol=1e-5), (out_bb, ref_bb)

    # 3) Native bf16 inputs stream as bf16 (half the HBM bytes), upcast in-kernel.
    xb = x.astype(jnp.bfloat16)
    yb = y.astype(jnp.bfloat16)
    out_bf = similarity(xb, yb, temp)
    jax.block_until_ready(out_bf)
    ref_bf = _reference(xb, yb, temp)
    assert jnp.allclose(out_bf, ref_bf, atol=2e-2, rtol=2e-2), (out_bf, ref_bf)

    print("KERNEL_OK")
</pallas_src>

<mosaic_0001>
module attributes {stable_mosaic.version = 11 : i64} {
  func.func @_cosine_sim_kernel(%arg0: i32, %arg1: memref<8x32xf32, #tpu.memory_space<vmem>>, %arg2: memref<8x32xf32, #tpu.memory_space<vmem>>, %arg3: memref<8x1xf32, #tpu.memory_space<vmem>>) attributes {dimension_semantics = [#tpu.dimension_semantics<parallel>], iteration_bounds = array<i64: 1>, scalar_prefetch = 0 : i64, scratch_operands = 0 : i64, tpu.core_type = #tpu.core_type<tc>, window_params = [{transform_indices = @transform_0, window_bounds = array<i64: 8, 32>}, {transform_indices = @transform_1, window_bounds = array<i64: 8, 32>}, {transform_indices = @transform_2, window_bounds = array<i64: 8, 1>}]} {
    %c0 = arith.constant 0 : index
    %c0_0 = arith.constant 0 : index
    %0 = vector.load %arg1[%c0, %c0_0] : memref<8x32xf32, #tpu.memory_space<vmem>>, vector<8x32xf32>
    %c0_1 = arith.constant 0 : index
    %c0_2 = arith.constant 0 : index
    %1 = vector.load %arg2[%c0_1, %c0_2] : memref<8x32xf32, #tpu.memory_space<vmem>>, vector<8x32xf32>
    %2 = arith.mulf %0, %1 : vector<8x32xf32>
    %cst = arith.constant dense<0.000000e+00> : vector<8xf32>
    %3 = vector.multi_reduction <add>, %2, %cst [1] : vector<8x32xf32> to vector<8xf32>
    %4 = vector.shape_cast %3 : vector<8xf32> to vector<8x1xf32>
    %5 = arith.mulf %0, %0 : vector<8x32xf32>
    %cst_3 = arith.constant dense<0.000000e+00> : vector<8xf32>
    %6 = vector.multi_reduction <add>, %5, %cst_3 [1] : vector<8x32xf32> to vector<8xf32>
    %7 = vector.shape_cast %6 : vector<8xf32> to vector<8x1xf32>
    %8 = math.sqrt %7 : vector<8x1xf32>
    %9 = arith.mulf %1, %1 : vector<8x32xf32>
    %cst_4 = arith.constant dense<0.000000e+00> : vector<8xf32>
    %10 = vector.multi_reduction <add>, %9, %cst_4 [1] : vector<8x32xf32> to vector<8xf32>
    %11 = vector.shape_cast %10 : vector<8xf32> to vector<8x1xf32>
    %12 = math.sqrt %11 : vector<8x1xf32>
    %13 = arith.mulf %8, %12 : vector<8x1xf32>
    %cst_5 = arith.constant 9.99999993E-9 : f32
    %14 = vector.broadcast %cst_5 : f32 to vector<8x1xf32>
    %15 = arith.maximumf %13, %14 : vector<8x1xf32>
    %16 = arith.divf %4, %15 : vector<8x1xf32>
    %cst_6 = arith.constant 2.000000e+01 : f32
    %17 = vector.broadcast %cst_6 : f32 to vector<8x1xf32>
    %18 = arith.mulf %16, %17 : vector<8x1xf32>
    %c0_7 = arith.constant 0 : index
    %c0_8 = arith.constant 0 : index
    %19 = vector.load %arg3[%c0_7, %c0_8] : memref<8x1xf32, #tpu.memory_space<vmem>>, vector<8x1xf32>
    tpu.vector_store %arg3[%c0_7, %c0_8], %18 {strides = array<i32>} : memref<8x1xf32, #tpu.memory_space<vmem>>, vector<8x1xf32>,
    return
  }
  func.func @transform_0(%arg0: i32) -> (i32, i32) {
    %c0_i32 = arith.constant 0 : i32
    %c0_i32_0 = arith.constant 0 : i32
    return %arg0, %c0_i32 : i32, i32
  }
  func.func @transform_1(%arg0: i32) -> (i32, i32) {
    %c0_i32 = arith.constant 0 : i32
    %c0_i32_0 = arith.constant 0 : i32
    return %arg0, %c0_i32 : i32, i32
  }
  func.func @transform_2(%arg0: i32) -> (i32, i32) {
    %c0_i32 = arith.constant 0 : i32
    %c0_i32_0 = arith.constant 0 : i32
    return %arg0, %c0_i32 : i32, i32
  }
}

</mosaic_0001>

<bundles_post_ra>
// kernel: tpu_custom_call.1
= control target key start
LH: loop header
LB: loop body
LE: loop exit
PB: predicated region body
PF: predicated region fallthrough
CT: control target
= control target key end

     0   :  { %7 = vsyncpa [#allocation3], 0  ;;  %s177_s0 = inlined_call_operand.hbm [shape: f32[8,32], index: 0, kind: input, shape index: {}]   ;;  %s178_s1 = inlined_call_operand.hbm [shape: f32[8,32], index: 1, kind: input, shape index: {}]   ;;  %s179_s2 = inlined_call_operand.vmem [shape: f32[8,1], index: 2, kind: output, shape index: {}]  }
   0x1   :  { %8 = vsyncpa [#allocation5], 0  ;;  %s133_s9 = smov [#allocation2]   ;;  %s134_s11 = smov [#allocation4]  }
   0x2   :  { %s15_s10 = sshll.u32 %s133_s9, 4  ;;  %s25_s12 = sshll.u32 %s134_s11, 4  ;;  %s16_s10 = int_to_ptr.vmem [resolvable:$true] %s15_s10  ;;  %s26_s12 = int_to_ptr.vmem [resolvable:$true] %s25_s12 }
   0x3   :  { %s85_s15 = scalar_lea.hbm %s177_s0, 128 }
   0x4   :  { %p86_p0 = scmp.ne.s32.totalorder %s177_s0, %s85_s15  ;;  %p89_p1 = scmp.lt.u32.totalorder %s85_s15, %s177_s0 }
   0x6   :  { %p91_p2 = pnand %p89_p1, %p86_p0 }
   0x8   :  { %94 = shalt.err (!%p91_p2)
}
   0x9   :  { %s95_s20 = scalar_lea.vmem %s16_s10, 128  ;;  %p100_p4 = scmp.lt.s32.totalorder %s16_s10, %s16_s10 }
   0xa   :  { %p96_p3 = scmp.ne.s32.totalorder %s16_s10, %s95_s20  ;;  %p101_p5 = scmp.lt.s32.totalorder %s95_s20, %s95_s20 }
   0xc   :  { %p102_p6 = por %p101_p5, %p100_p4 }
   0xe   :  { %p103_p7 = pnand %p102_p6, %p96_p3 }
  0x10   :  { %106 = shalt.err (!%p103_p7)
}
  0x11   :  { %18 = dma.hbm_to_vmem [thread:$0]  %s177_s0, 128, %s16_s10, [#allocation3]  }
  0x12   :  { %s107_s25 = scalar_lea.hbm %s178_s1, 128 }
  0x13   :  { %p108_p8 = scmp.ne.s32.totalorder %s178_s1, %s107_s25  ;;  %p111_p9 = scmp.lt.u32.totalorder %s107_s25, %s178_s1 }
  0x15   :  { %p113_p10 = pnand %p111_p9, %p108_p8 }
  0x17   :  { %116 = shalt.err (!%p113_p10)
}
  0x18   :  { %s117_s30 = scalar_lea.vmem %s26_s12, 128  ;;  %p122_p12 = scmp.lt.s32.totalorder %s26_s12, %s26_s12 }
  0x19   :  { %p118_p11 = scmp.ne.s32.totalorder %s26_s12, %s117_s30  ;;  %p123_p13 = scmp.lt.s32.totalorder %s117_s30, %s117_s30 }
  0x1b   :  { %p124_p0 = por %p123_p13, %p122_p12 }
  0x1d   :  { %p125_p1 = pnand %p124_p0, %p118_p11 }
  0x1f   :  { %128 = shalt.err (!%p125_p1)
}
  0x20   :  { %28 = dma.hbm_to_vmem [thread:$0]  %s178_s1, 128, %s26_s12, [#allocation5]  }
  0x21   :  { %129 = dma.done.wait [#allocation3], 128  }
  0x22   :  { %130 = vsyncadd [#allocation3], 4294967168 }
  0x23   :  { %131 = dma.done.wait [#allocation5], 128  }
  0x24   :  { %132 = vsyncadd [#allocation5], 4294967168  ;;  %v35_v0 = vld [vmem:[#allocation2] sm:$0xff]  ;;  %vm38_vm0 = vcmask 261120   ;;  %v36_v1 = vld [vmem:[#allocation4] sm:$0xff]  ;;  %vm69_vm5 = vcmask 7168  }
  0x25   :  { %v42_v2 = vmul.f32 %v35_v0, %v35_v0  ;;  %v53_v3 = vmul.f32 %v36_v1, %v36_v1  ;;  %v37_v4 = vmul.f32 %v36_v1, %v35_v0 }
  0x27   :  { %v43_v5 = vsel %vm38_vm0, %v42_v2, 0.0  ;;  %v39_v6 = vsel %vm38_vm0, %v37_v4, 0.0  ;;  %v54_v7 = vsel %vm38_vm0, %v53_v3, 0.0 }
  0x28   :  { %44 = vadd.xlane.f32.xlu0 %v43_v5  ;;  %40 = vadd.xlane.f32.xlu1 %v39_v6 }
  0x2c   :  { %55 = vadd.xlane.f32.xlu0 %v54_v7 }
  0xb5   :  { %v45_v8 = vpop.xlane.xlu0 %44  ;;  %v41_v22 = vpop.xlane.xlu1 %40 }
  0xb6   :  { %79 = vrsqrt.f32 %v45_v8  ;;  %vm48_vm1 = vcmp.eq.f32.partialorder %v45_v8, inf  ;;  %v51_v15 = vand.u32 2147483648, %v45_v8  ;;  %vm50_vm3 = vcmp.eq.f32.partialorder %v45_v8, 0.0 }
  0xb9   :  { %v56_v9 = vpop.xlane.xlu0 %55 }
  0xba   :  { %81 = vrsqrt.f32 %v56_v9  ;;  %vm59_vm2 = vcmp.eq.f32.partialorder %v56_v9, inf  ;;  %v62_v16 = vand.u32 2147483648, %v56_v9  ;;  %vm61_vm4 = vcmp.eq.f32.partialorder %v56_v9, 0.0 }
  0xc0   :  { %v80_v10 = vpop.eup %79 }
  0xc1   :  { %v47_v11 = vmul.f32 %v80_v10, %v45_v8 }
  0xc3   :  { %v49_v13 = vsel %vm48_vm1, %v45_v8, %v47_v11 }
  0xc4   :  { %v82_v12 = vpop.eup %81  ;;  %v52_v18 = vsel %vm50_vm3, %v51_v15, %v49_v13 }
  0xc5   :  { %v58_v14 = vmul.f32 %v82_v12, %v56_v9 }
  0xc7   :  { %v60_v17 = vsel %vm59_vm2, %v56_v9, %v58_v14 }
  0xc8   :  { %v63_v19 = vsel %vm61_vm4, %v62_v16, %v60_v17 }
  0xc9   :  { %v64_v20 = vmul.f32 %v63_v19, %v52_v18 }
  0xcb   :  { %v65_v21 = vmax.f32 %v64_v20, 1e-08 }
  0xcd   :  { %83 = vrcp.f32 %v65_v21 }
  0xd7   :  { %v84_v23 = vpop.eup %83 }
  0xd8   :  { %v67_v24 = vmul.f32 %v84_v23, %v41_v22 }
  0xda   :  { %v68_v25 = vmul.f32 20.0, %v67_v24 }
  0xdc   :  { %70 = vst.msk [vmem:[%s179_s2] sm:$0xff] %vm69_vm5, %v68_v25 }
  0xdd   :  { %75 = vsyncpa [#allocation3], 1 }
  0xde   :  { %76 = vsyncpa [#allocation5], 1 }

</bundles_post_ra>
